<compile_context>
chip_gen: v7x
topology: tpu7x:2x2x1
jax: 0.10.0
libtpu: 0.0.40
codegen_flags: <defaults>
</compile_context>

<pallas_src>
import functools
import math

import jax
import jax.numpy as jnp
from jax.experimental import pallas as pl
from jax.experimental.pallas import tpu as pltpu


NUM_OPS = 5  # synthetic SMMT_CANDIDATES stand-in


def _fusion_kernel(w_ref, x_ref, y_ref, wx_ref, wy_ref, bcat_ref, bg_ref,
                   o_ref, *, matmul_dtype):
    """One grid step: a (Bt, L, D) block of x / y -> (Bt, L, D) block of out."""
    x3 = x_ref[...]                          # (Bt, L, D) float32
    y3 = y_ref[...]
    bt, L, D = x3.shape

    # Architecture weights: softmax(betas) precomputed in the wrapper, resident
    # in SMEM -> scalar (sreg) reads, plain scalar*vector VPU ops in the combine.
    w0 = w_ref[0]
    w1 = w_ref[1]
    w2 = w_ref[2]
    w3 = w_ref[3]
    w4 = w_ref[4]

    # Flatten batch into the sublane axis for elementwise / linear ops
    # (leading-dim merge only; layout-preserving since bt == 1 or L % 8 == 0).
    x2 = x3.reshape(bt * L, D)
    y2 = y3.reshape(bt * L, D)

    # ---- op 0 / op 1: sum & hadamard (VPU, f32) ----------------------------
    op_sum = x2 + y2
    op_mul = x2 * y2

    # ---- op 2 / op 3: concat-linear-relu & gated fusion --------------------
    # Both x-LHS matmuls fused into one MXU matmul against [Wcat_x | Wg]
    # (pre-stacked & pre-cast in the wrapper).  Accumulation stays float32.
    x_mm = x2.astype(matmul_dtype)
    y_mm = y2.astype(matmul_dtype)
    pre_x = jnp.dot(x_mm, wx_ref[...],
                    preferred_element_type=jnp.float32)        # (bt*L, 2D)
    cat_pre = (pre_x[:, :D]
               + jnp.dot(y_mm, wy_ref[...],
                         preferred_element_type=jnp.float32)
               + bcat_ref[...])
    op_cat = jnp.maximum(cat_pre, 0.0)
    op_gate = jax.nn.sigmoid(pre_x[:, D:] + bg_ref[...]) * y2

    # ---- op 4: scaled dot-product attention of x over y --------------------
    # Batched einsum folds the K-transpose into the MXU feed (no explicit .T /
    # XLU transpose); softmax denominator uses the EUP approx reciprocal.
    xq = x3.astype(matmul_dtype)
    yk = y3.astype(matmul_dtype)
    scores = jnp.einsum("bld,bmd->blm", xq, yk,
                        preferred_element_type=jnp.float32)
    scores = scores * (1.0 / math.sqrt(D))
    m = jnp.max(scores, axis=-1, keepdims=True)
    p = jnp.exp(scores - m)
    denom = jnp.sum(p, axis=-1, keepdims=True)
    probs = p * pl.reciprocal(denom, approx=True)
    op_attn = jnp.einsum("blm,bmd->bld", probs.astype(matmul_dtype), yk,
                         preferred_element_type=jnp.float32)   # (bt, L, D)

    # ---- weighted combine (SMEM scalar weights, f32) -----------------------
    out2 = w0 * op_sum + w1 * op_mul + w2 * op_cat + w3 * op_gate
    out3 = out2.reshape(bt, L, D) + w4 * op_attn

    # TODO(synk): with D=32 the output store is lane-masked (25% lane use); a
    # lane-dense (.., L*D) writeback would need a cross-lane value reshape that
    # Mosaic does not reliably support, so the natural (Bt, L, D) store is kept.
    o_ref[...] = out3.astype(o_ref.dtype)


def _pick_block_batch(B, L, D, budget_bytes=2 << 20):
    """Largest batch block that (a) divides B, (b) keeps the per-step working
    set around a few MiB, (c) leaves >=2 grid steps when B >= 2 (both v7x
    TensorCores get work), (d) keeps the in-kernel reshapes layout-preserving.
    """
    per_batch = 4 * (5 * L * D + 2 * L * L)   # rough f32 working set per batch
    best = 1
    for cand in range(1, B + 1):
        if B % cand != 0:
            continue
        if cand > 1 and L % 8 != 0:
            continue
        if cand * per_batch > budget_bytes:
            continue
        if B >= 2 and B // cand < 2:
            continue
        best = cand
    return best


def searchable_fusion_cell(x, y, betas, wcat, bcat, wg, bg, *,
                           matmul_dtype=jnp.bfloat16, block_batch=None):
    """Pallas wrapper.  x, y: (B, L, D) float32 -> (B, L, D)."""
    B, L, D = x.shape
    num_ops = betas.shape[-1]
    assert num_ops == NUM_OPS, "kernel hardcodes the 5 synthetic candidates"

    # softmax(betas) once on the wrapper side; the 5 weights ride in SMEM.
    w = jax.nn.softmax(betas.astype(jnp.float32), axis=-1)        # (5,)

    # Pre-split / pre-fuse weights so the kernel never loads-then-slices:
    #   wx = [Wcat_x | Wg] : (D, 2D) -> single fused x-LHS matmul
    #   wy = Wcat_y        : (D, D)
    wx = jnp.concatenate([wcat[:D, :], wg], axis=1).astype(matmul_dtype)
    wy = wcat[D:, :].astype(matmul_dtype)
    bcat2 = bcat.reshape(1, D).astype(jnp.float32)
    bg2 = bg.reshape(1, D).astype(jnp.float32)

    bt = block_batch if block_batch is not None else _pick_block_batch(B, L, D)
    assert B % bt == 0
    grid = (B // bt,)

    kernel = functools.partial(_fusion_kernel, matmul_dtype=matmul_dtype)

    return pl.pallas_call(
        kernel,
        out_shape=jax.ShapeDtypeStruct((B, L, D), x.dtype),
        grid=grid,
        in_specs=[
            pl.BlockSpec(memory_space=pltpu.MemorySpace.SMEM),   # softmax(betas)
            pl.BlockSpec((bt, L, D), lambda b: (b, 0, 0)),       # x
            pl.BlockSpec((bt, L, D), lambda b: (b, 0, 0)),       # y
            pl.BlockSpec((D, 2 * D), lambda b: (0, 0)),          # wx = [Wcat_x|Wg]
            pl.BlockSpec((D, D), lambda b: (0, 0)),              # wy = Wcat_y
            pl.BlockSpec((1, D), lambda b: (0, 0)),              # bcat
            pl.BlockSpec((1, D), lambda b: (0, 0)),              # bg
        ],
        out_specs=pl.BlockSpec((bt, L, D), lambda b: (b, 0, 0)),
        compiler_params=pltpu.CompilerParams(
            dimension_semantics=("parallel",),
            vmem_limit_bytes=48 * 1024 * 1024),
    )(w, x, y, wx, wy, bcat2, bg2)


def _reference(x, y, betas, wcat, bcat, wg, bg):
    """Pure-JAX reference mirroring the PyTorch forward (f32)."""
    B, L, D = x.shape
    w = jax.nn.softmax(betas, axis=-1)
    op_sum = x + y
    op_mul = x * y
    cat = jnp.concatenate([x, y], axis=-1)
    op_cat = jax.nn.relu(jnp.einsum("bld,de->ble", cat, wcat) + bcat)
    op_gate = jax.nn.sigmoid(jnp.einsum("bld,de->ble", x, wg) + bg) * y
    scores = jnp.einsum("bld,bmd->blm", x, y) / math.sqrt(D)
    op_attn = jnp.einsum("blm,bmd->bld", jax.nn.softmax(scores, axis=-1), y)
    return (w[0] * op_sum + w[1] * op_mul + w[2] * op_cat
            + w[3] * op_gate + w[4] * op_attn)


if __name__ == "__main__":
    B, L, D = 2, 8, 32

    key = jax.random.PRNGKey(0)
    k_x, k_y, k_b, k_wc, k_bc, k_wg, k_bg = jax.random.split(key, 7)

    x = jax.random.normal(k_x, (B, L, D), dtype=jnp.float32)
    y = jax.random.normal(k_y, (B, L, D), dtype=jnp.float32)

    # Deterministic "module" parameters (shapes from __init__ semantics).
    betas = 0.001 * jax.random.normal(k_b, (NUM_OPS,), dtype=jnp.float32)
    wcat = 0.05 * jax.random.normal(k_wc, (2 * D, D), dtype=jnp.float32)
    bcat = 0.05 * jax.random.normal(k_bc, (D,), dtype=jnp.float32)
    wg = 0.05 * jax.random.normal(k_wg, (D, D), dtype=jnp.float32)
    bg = 0.05 * jax.random.normal(k_bg, (D,), dtype=jnp.float32)

    ref = _reference(x, y, betas, wcat, bcat, wg, bg)

    # float32-MXU path: tight correctness check.
    out_f32 = jax.block_until_ready(
        searchable_fusion_cell(x, y, betas, wcat, bcat, wg, bg,
                               matmul_dtype=jnp.float32))
    assert out_f32.shape == (B, L, D)
    assert jnp.allclose(out_f32, ref, rtol=2e-3, atol=2e-3), "f32 mismatch"

    # bf16-MXU path (default fast path on v5e/v6e/v7x): looser check.
    out_bf16 = jax.block_until_ready(
        searchable_fusion_cell(x, y, betas, wcat, bcat, wg, bg,
                               matmul_dtype=jnp.bfloat16))
    assert out_bf16.shape == (B, L, D)
    assert jnp.allclose(out_bf16, ref, rtol=2e-2, atol=2e-2), "bf16 mismatch"

    print("KERNEL_OK")
</pallas_src>

<mosaic_0001>
module attributes {stable_mosaic.version = 11 : i64} {
  func.func @_fusion_kernel(%arg0: i32, %arg1: memref<5xf32, #tpu.memory_space<smem>>, %arg2: memref<1x8x32xf32, #tpu.memory_space<vmem>>, %arg3: memref<1x8x32xf32, #tpu.memory_space<vmem>>, %arg4: memref<32x64xf32, #tpu.memory_space<vmem>>, %arg5: memref<32x32xf32, #tpu.memory_space<vmem>>, %arg6: memref<1x32xf32, #tpu.memory_space<vmem>>, %arg7: memref<1x32xf32, #tpu.memory_space<vmem>>, %arg8: memref<1x8x32xf32, #tpu.memory_space<vmem>>) attributes {dimension_semantics = [#tpu.dimension_semantics<parallel>], iteration_bounds = array<i64: 2>, scalar_prefetch = 0 : i64, scratch_operands = 0 : i64, tpu.core_type = #tpu.core_type<tc>, window_params = [{transform_indices = @transform_0, window_bounds = array<i64: 5>}, {transform_indices = @transform_1, window_bounds = array<i64: 1, 8, 32>}, {transform_indices = @transform_2, window_bounds = array<i64: 1, 8, 32>}, {pipeline_mode = #tpu.pipeline_mode<synchronous>, transform_indices = @transform_3, window_bounds = array<i64: 32, 64>}, {pipeline_mode = #tpu.pipeline_mode<synchronous>, transform_indices = @transform_4, window_bounds = array<i64: 32, 32>}, {pipeline_mode = #tpu.pipeline_mode<synchronous>, transform_indices = @transform_5, window_bounds = array<i64: 1, 32>}, {pipeline_mode = #tpu.pipeline_mode<synchronous>, transform_indices = @transform_6, window_bounds = array<i64: 1, 32>}, {transform_indices = @transform_7, window_bounds = array<i64: 1, 8, 32>}]} {
    %c0 = arith.constant 0 : index
    %c0_0 = arith.constant 0 : index
    %c0_1 = arith.constant 0 : index
    %0 = vector.load %arg2[%c0, %c0_0, %c0_1] : memref<1x8x32xf32, #tpu.memory_space<vmem>>, vector<1x8x32xf32>
    %c0_2 = arith.constant 0 : index
    %c0_3 = arith.constant 0 : index
    %c0_4 = arith.constant 0 : index
    %1 = vector.load %arg3[%c0_2, %c0_3, %c0_4] : memref<1x8x32xf32, #tpu.memory_space<vmem>>, vector<1x8x32xf32>
    %c0_5 = arith.constant 0 : index
    %2 = memref.load %arg1[%c0_5] : memref<5xf32, #tpu.memory_space<smem>>
    %c1 = arith.constant 1 : index
    %3 = memref.load %arg1[%c1] : memref<5xf32, #tpu.memory_space<smem>>
    %c2 = arith.constant 2 : index
    %4 = memref.load %arg1[%c2] : memref<5xf32, #tpu.memory_space<smem>>
    %c3 = arith.constant 3 : index
    %5 = memref.load %arg1[%c3] : memref<5xf32, #tpu.memory_space<smem>>
    %c4 = arith.constant 4 : index
    %6 = memref.load %arg1[%c4] : memref<5xf32, #tpu.memory_space<smem>>
    %7 = vector.shape_cast %0 : vector<1x8x32xf32> to vector<8x32xf32>
    %8 = vector.shape_cast %1 : vector<1x8x32xf32> to vector<8x32xf32>
    %9 = arith.addf %7, %8 : vector<8x32xf32>
    %10 = arith.mulf %7, %8 : vector<8x32xf32>
    %c0_6 = arith.constant 0 : index
    %c0_7 = arith.constant 0 : index
    %11 = vector.load %arg4[%c0_6, %c0_7] : memref<32x64xf32, #tpu.memory_space<vmem>>, vector<32x64xf32>
    %cst = arith.constant dense<0.000000e+00> : vector<8x64xf32>
    %12 = tpu.matmul %7, %11, %cst {dimension_numbers = #tpu.dot_dimension_numbers<[1], [0], [0], [1], [0, 0, 1, 1], [], []>} : vector<8x32xf32>, vector<32x64xf32>, vector<8x64xf32> -> vector<8x64xf32>
    %13 = vector.extract_strided_slice %12 {offsets = [0, 0], sizes = [8, 32], strides = [1, 1]} : vector<8x64xf32> to vector<8x32xf32>
    %c0_8 = arith.constant 0 : index
    %c0_9 = arith.constant 0 : index
    %14 = vector.load %arg5[%c0_8, %c0_9] : memref<32x32xf32, #tpu.memory_space<vmem>>, vector<32x32xf32>
    %cst_10 = arith.constant dense<0.000000e+00> : vector<8x32xf32>
    %15 = tpu.matmul %8, %14, %cst_10 {dimension_numbers = #tpu.dot_dimension_numbers<[1], [0], [0], [1], [0, 0, 1, 1], [], []>} : vector<8x32xf32>, vector<32x32xf32>, vector<8x32xf32> -> vector<8x32xf32>
    %16 = arith.addf %13, %15 : vector<8x32xf32>
    %c0_11 = arith.constant 0 : index
    %c0_12 = arith.constant 0 : index
    %17 = vector.load %arg6[%c0_11, %c0_12] : memref<1x32xf32, #tpu.memory_space<vmem>>, vector<1x32xf32>
    %18 = vector.broadcast %17 : vector<1x32xf32> to vector<8x32xf32>
    %19 = arith.addf %16, %18 : vector<8x32xf32>
    %cst_13 = arith.constant 0.000000e+00 : f32
    %20 = vector.broadcast %cst_13 : f32 to vector<8x32xf32>
    %21 = arith.maximumf %19, %20 : vector<8x32xf32>
    %22 = vector.extract_strided_slice %12 {offsets = [0, 32], sizes = [8, 32], strides = [1, 1]} : vector<8x64xf32> to vector<8x32xf32>
    %c0_14 = arith.constant 0 : index
    %c0_15 = arith.constant 0 : index
    %23 = vector.load %arg7[%c0_14, %c0_15] : memref<1x32xf32, #tpu.memory_space<vmem>>, vector<1x32xf32>
    %24 = vector.broadcast %23 : vector<1x32xf32> to vector<8x32xf32>
    %25 = arith.addf %22, %24 : vector<8x32xf32>
    %26 = arith.negf %25 : vector<8x32xf32>
    %27 = math.exp %26 : vector<8x32xf32>
    %cst_16 = arith.constant 1.000000e+00 : f32
    %28 = vector.broadcast %cst_16 : f32 to vector<8x32xf32>
    %29 = arith.addf %28, %27 : vector<8x32xf32>
    %30 = arith.divf %28, %29 : vector<8x32xf32>
    %31 = arith.mulf %30, %8 : vector<8x32xf32>
    "tpu.trace_start"() <{level = 10 : i32, message = "bld,bmd->blm"}> : () -> ()
    %cst_17 = arith.constant dense<0.000000e+00> : vector<1x8x8xf32>
    %32 = tpu.matmul %0, %1, %cst_17 {dimension_numbers = #tpu.dot_dimension_numbers<[2], [2], [1], [1], [0, 0, 0, 1, 1, 1], [0], [0]>} : vector<1x8x32xf32>, vector<1x8x32xf32>, vector<1x8x8xf32> -> vector<1x8x8xf32>
    "tpu.trace_stop"() : () -> ()
    %cst_18 = arith.constant 0.176776692 : f32
    %33 = vector.broadcast %cst_18 : f32 to vector<1x8x8xf32>
    %34 = arith.mulf %32, %33 : vector<1x8x8xf32>
    %cst_19 = arith.constant dense<0xFF800000> : vector<1x8xf32>
    %35 = vector.multi_reduction <maximumf>, %34, %cst_19 [2] : vector<1x8x8xf32> to vector<1x8xf32>
    %36 = vector.shape_cast %35 : vector<1x8xf32> to vector<1x8x1xf32>
    %37 = vector.broadcast %36 : vector<1x8x1xf32> to vector<1x8x8xf32>
    %38 = arith.subf %34, %37 : vector<1x8x8xf32>
    %39 = math.exp %38 : vector<1x8x8xf32>
    %cst_20 = arith.constant dense<0.000000e+00> : vector<1x8xf32>
    %40 = vector.multi_reduction <add>, %39, %cst_20 [2] : vector<1x8x8xf32> to vector<1x8xf32>
    %41 = vector.shape_cast %40 : vector<1x8xf32> to vector<1x8x1xf32>
    %42 = tpu.reciprocal %41 {approx = true} : vector<1x8x1xf32> -> vector<1x8x1xf32>
    %43 = vector.broadcast %42 : vector<1x8x1xf32> to vector<1x8x8xf32>
    %44 = arith.mulf %39, %43 : vector<1x8x8xf32>
    "tpu.trace_start"() <{level = 10 : i32, message = "blm,bmd->bld"}> : () -> ()
    %cst_21 = arith.constant dense<0.000000e+00> : vector<1x8x32xf32>
    %45 = tpu.matmul %44, %1, %cst_21 {dimension_numbers = #tpu.dot_dimension_numbers<[2], [1], [1], [2], [0, 0, 0, 1, 1, 2], [0], [0]>} : vector<1x8x8xf32>, vector<1x8x32xf32>, vector<1x8x32xf32> -> vector<1x8x32xf32>
    "tpu.trace_stop"() : () -> ()
    %46 = vector.broadcast %2 : f32 to vector<8x32xf32>
    %47 = arith.mulf %46, %9 : vector<8x32xf32>
    %48 = vector.broadcast %3 : f32 to vector<8x32xf32>
    %49 = arith.mulf %48, %10 : vector<8x32xf32>
    %50 = arith.addf %47, %49 : vector<8x32xf32>
    %51 = vector.broadcast %4 : f32 to vector<8x32xf32>
    %52 = arith.mulf %51, %21 : vector<8x32xf32>
    %53 = arith.addf %50, %52 : vector<8x32xf32>
    %54 = vector.broadcast %5 : f32 to vector<8x32xf32>
    %55 = arith.mulf %54, %31 : vector<8x32xf32>
    %56 = arith.addf %53, %55 : vector<8x32xf32>
    %57 = vector.shape_cast %56 : vector<8x32xf32> to vector<1x8x32xf32>
    %58 = vector.broadcast %6 : f32 to vector<1x8x32xf32>
    %59 = arith.mulf %58, %45 : vector<1x8x32xf32>
    %60 = arith.addf %57, %59 : vector<1x8x32xf32>
    %c0_22 = arith.constant 0 : index
    %c0_23 = arith.constant 0 : index
    %c0_24 = arith.constant 0 : index
    %61 = vector.load %arg8[%c0_22, %c0_23, %c0_24] : memref<1x8x32xf32, #tpu.memory_space<vmem>>, vector<1x8x32xf32>
    tpu.vector_store %arg8[%c0_22, %c0_23, %c0_24], %60 {strides = array<i32>} : memref<1x8x32xf32, #tpu.memory_space<vmem>>, vector<1x8x32xf32>,
    return
  }
  func.func @transform_0(%arg0: i32) -> i32 {
    %c0_i32 = arith.constant 0 : i32
    %c0_i32_0 = arith.constant 0 : i32
    return %c0_i32 : i32
  }
  func.func @transform_1(%arg0: i32) -> (i32, i32, i32) {
    %c0_i32 = arith.constant 0 : i32
    %c0_i32_0 = arith.constant 0 : i32
    %c0_i32_1 = arith.constant 0 : i32
    return %arg0, %c0_i32, %c0_i32_0 : i32, i32, i32
  }
  func.func @transform_2(%arg0: i32) -> (i32, i32, i32) {
    %c0_i32 = arith.constant 0 : i32
    %c0_i32_0 = arith.constant 0 : i32
    %c0_i32_1 = arith.constant 0 : i32
    return %arg0, %c0_i32, %c0_i32_0 : i32, i32, i32
  }
  func.func @transform_3(%arg0: i32) -> (i32, i32) {
    %c0_i32 = arith.constant 0 : i32
    %c0_i32_0 = arith.constant 0 : i32
    %c0_i32_1 = arith.constant 0 : i32
    return %c0_i32, %c0_i32_0 : i32, i32
  }
  func.func @transform_4(%arg0: i32) -> (i32, i32) {
    %c0_i32 = arith.constant 0 : i32
    %c0_i32_0 = arith.constant 0 : i32
    %c0_i32_1 = arith.constant 0 : i32
    return %c0_i32, %c0_i32_0 : i32, i32
  }
  func.func @transform_5(%arg0: i32) -> (i32, i32) {
    %c0_i32 = arith.constant 0 : i32
    %c0_i32_0 = arith.constant 0 : i32
    %c0_i32_1 = arith.constant 0 : i32
    return %c0_i32, %c0_i32_0 : i32, i32
  }
  func.func @transform_6(%arg0: i32) -> (i32, i32) {
    %c0_i32 = arith.constant 0 : i32
    %c0_i32_0 = arith.constant 0 : i32
    %c0_i32_1 = arith.constant 0 : i32
    return %c0_i32, %c0_i32_0 : i32, i32
  }
  func.func @transform_7(%arg0: i32) -> (i32, i32, i32) {
    %c0_i32 = arith.constant 0 : i32
    %c0_i32_0 = arith.constant 0 : i32
    %c0_i32_1 = arith.constant 0 : i32
    return %arg0, %c0_i32, %c0_i32_0 : i32, i32, i32
  }
}

</mosaic_0001>

<bundles_post_ra>
// kernel: tpu_custom_call.1
= control target key start
LH: loop header
LB: loop body
LE: loop exit
PB: predicated region body
PF: predicated region fallthrough
CT: control target
= control target key end

     0   :  { %s1651_s0 = inlined_call_operand.hbm [shape: f32[5], index: 0, kind: input, shape index: {}]   ;;  %s1652_s1 = inlined_call_operand.hbm [shape: f32[2,8,32], index: 1, kind: input, shape index: {}]   ;;  %s1653_s2 = inlined_call_operand.hbm [shape: f32[2,8,32], index: 2, kind: input, shape index: {}]   ;;  %s1654_s3 = inlined_call_operand.hbm [shape: f32[32,64], index: 3, kind: input, shape index: {}]   ;;  %s1655_s4 = inlined_call_operand.hbm [shape: f32[32,32], index: 4, kind: input, shape index: {}]   ;;  %s1656_s5 = inlined_call_operand.vmem [shape: f32[1,32], index: 5, kind: input, shape index: {}]   ;;  %s1657_s6 = inlined_call_operand.vmem [shape: f32[1,32], index: 6, kind: input, shape index: {}]   ;;  %s1658_s7 = inlined_call_operand.hbm [shape: f32[2,8,32], index: 7, kind: output, shape index: {}]  }
   0x1   :  { %1664 = sst [smem:[#allocation20_spill]] %s1651_s0 }
   0x2   :  { %1665 = sst [smem:[#allocation21_spill]] %s1654_s3 }
   0x3   :  { %1666 = sst [smem:[#allocation22_spill]] %s1655_s4 }
   0x4   :  { %12 = vsyncpa [#allocation5], 0 }
   0x5   :  { %13 = vsyncpa [#allocation3], 0 }
   0x6   :  { %15 = vsyncpa [#allocation3 + $0x1], 0 }
   0x7   :  { %16 = vsyncpa [#allocation8], 0 }
   0x8   :  { %18 = vsyncpa [#allocation8 + $0x1], 0 }
   0x9   :  { %19 = vsyncpa [#allocation11], 0 }
   0xa   :  { %20 = vsyncpa [#allocation4], 0 }
   0xb   :  { %22 = vsyncpa [#allocation4 + $0x1], 0  ;;  %s1333_s24 = smov 0   ;;  %s1335_s25 = smov 0  }
   0xc   :  { %s1337_s26 = smov 0   ;;  %s1339_s27 = smov 0  }
   0xd LB: > { %s1354_s28 = sadd.s32 4294967295, %s1278_s27   ;;  %s879_s29 = sadd.s32 4294967294, %s1278_s27   ;;  %s1278_s27 = sphi %s1339_s27, %s1694_s27   ;;  %s1274_s26 = sphi %s1337_s26, %s1693_s26   ;;  %s1270_s25 = sphi %s1335_s25, %s1692_s25   ;;  %s1266_s24 = sphi %s1333_s24, %s1691_s24  }
   0xe   : > { %p69_p0 = scmp.ne.s32.totalorder %s1270_s25, %s1266_s24  ;;  %p1659_p1 = scmp.eq.s32.totalorder %s1354_s28, 0 }
   0xf   : > { %p209_p3 = scmp.eq.s32.totalorder %s879_s29, 1  ;;  %p880_p5 = scmp.ge.s32.totalorder %s1278_s27, 1 }
  0x10   : > { %p1363_p4 = por %p1659_p1, %p69_p0  ;;  %p216_p7 = scmp.lt.s32.totalorder %s1278_s27, 3 }
  0x11   : > { %p1368_p6 = por %p209_p3, %p69_p0  ;;  %s1280_s10 = smov [#allocation9]  }
  0x12   : > { %s1667_s30 = scalar_select %p1363_p4, 1, 0 }
  0x13   : > { %s1668_s8 = scalar_select %p1368_p6, 1, 0 }
  0x14   : > { %p1373_p8 = pnand %p880_p5, %p216_p7  ;;  %s237_s11 = sshll.u32 %s1280_s10, 4  ;;  %s1377_s11 = int_to_ptr.vmem [resolvable:$true] %s237_s11 }
  0x15   : > { %1669 = sst [smem:[#allocation19_spill]] %s1668_s8  ;;  %s1281_s13 = smov [#allocation10]  }
  0x16   : > { %s1670_s9 = scalar_select %p1373_p8, 1, 0 }
  0x17   : > { %p988_p9 = pneg %p1373_p8  ;;  %s250_s14 = sshll.u32 %s1281_s13, 4  ;;  %s1388_s14 = int_to_ptr.vmem [resolvable:$true] %s250_s14 }
  0x18   : > { %s1672_s3 = sld [smem:[#allocation21_spill]] }
  0x19   : > { %p1384_p11 = pnand %p988_p9, %p1659_p1 }
  0x1b   : > { %p1398_p13 = pneg %p1384_p11 }
  0x1e   : > { %s1067_s17 = scalar_lea.hbm %s1672_s3, 512 }
  0x1f   : > { %p1068_p12 = scmp.ne.s32.totalorder %s1672_s3, %s1067_s17  ;;  %p1074_p5 = scmp.lt.u32.totalorder %s1067_s17, %s1672_s3 }
  0x21   : > { %p1070_p0 = pnand %p1398_p13, %p1068_p12 }
  0x23   : > { %p1071_p3 = pneg %p1070_p0 }
  0x25   : > { %p1076_p7 = pnand %p1074_p5, %p1071_p3 }
  0x27   : > { %1079 = shalt.err (!%p1076_p7)
}
  0x28   : > { %s1080_s23 = scalar_lea.vmem %s1377_s11, 512  ;;  %p1088_p2 = scmp.lt.s32.totalorder %s1377_s11, %s1377_s11 }
  0x29   : > { %p1081_p9 = scmp.ne.s32.totalorder %s1377_s11, %s1080_s23  ;;  %p1089_p6 = scmp.lt.s32.totalorder %s1080_s23, %s1080_s23 }
  0x2b   : > { %p1083_p10 = pnand %p1081_p9, %p1398_p13  ;;  %p1090_p12 = por %p1089_p6, %p1088_p2 }
  0x2d   : > { %p1084_p1 = pneg %p1083_p10 }
  0x2f   : > { %p1091_p0 = pnand %p1090_p12, %p1084_p1 }
  0x31   : > { %1094 = shalt.err (!%p1091_p0)
}
  0x32   : > { %s1282_s29 = smov 128   ;;  %s1283_s10 = smov 8  }
  0x33   : > { %994 = dma.hbm_to_vmem [thread:$0]  (!%p1384_p11), %s1672_s3, 512, %s1377_s11, [#allocation8], %s1282_s29, %s1282_s29, %s1283_s10  }
  0x34   : > { %s1674_s0 = sld [smem:[#allocation20_spill]] }
  0x3a   : > { %s1095_s18 = scalar_lea.hbm %s1674_s0, 16 }
  0x3b   : > { %p1096_p1 = scmp.ne.s32.totalorder %s1674_s0, %s1095_s18  ;;  %p1102_p10 = scmp.lt.u32.totalorder %s1095_s18, %s1674_s0 }
  0x3d   : > { %p1098_p2 = pnand %p1096_p1, %p1398_p13 }
  0x3f   : > { %p1099_p6 = pneg %p1098_p2 }
  0x41   : > { %p1104_p3 = pnand %p1102_p10, %p1099_p6 }
  0x43   : > { %1107 = shalt.err (!%p1104_p3)
}
  0x44   : > { %s1284_s8 = smov [#allocation2]   ;;  %s1675_s4 = sld [smem:[#allocation22_spill]] }
  0x45   : > { %991 = dma.hbm_to_smem (!%p1384_p11), %s1674_s0, 16, %s1284_s8, [#allocation5]  }
  0x4a   : > { %s1108_s17 = scalar_lea.hbm %s1675_s4, 512 }
  0x4b   : > { %p1109_p5 = scmp.ne.s32.totalorder %s1675_s4, %s1108_s17  ;;  %p1115_p12 = scmp.lt.u32.totalorder %s1108_s17, %s1675_s4 }
  0x4d   : > { %p1111_p7 = pnand %p1109_p5, %p1398_p13 }
  0x4f   : > { %p1112_p9 = pneg %p1111_p7 }
  0x51   : > { %p1117_p0 = pnand %p1115_p12, %p1112_p9 }
  0x53   : > { %1120 = shalt.err (!%p1117_p0)
}
  0x54   : > { %s1121_s8 = scalar_lea.vmem %s1388_s14, 512  ;;  %p1129_p10 = scmp.lt.s32.totalorder %s1388_s14, %s1388_s14 }
  0x55   : > { %p1122_p1 = scmp.ne.s32.totalorder %s1388_s14, %s1121_s8  ;;  %p1130_p3 = scmp.lt.s32.totalorder %s1121_s8, %s1121_s8 }
  0x57   : > { %p1124_p2 = pnand %p1122_p1, %p1398_p13  ;;  %p1131_p5 = por %p1130_p3, %p1129_p10 }
  0x59   : > { %p1125_p6 = pneg %p1124_p2 }
  0x5b   : > { %p1132_p7 = pnand %p1131_p5, %p1125_p6 }
  0x5d   : > { %1135 = shalt.err (!%p1132_p7)
}
  0x5e   : > { %997 = dma.hbm_to_vmem [thread:$0]  (!%p1384_p11), %s1675_s4, 512, %s1388_s14, [#allocation11], %s1282_s29, %s1282_s29, %s1283_s10  }
  0x5f   : > { %s1465_s12 = sadd.s32 1, %s1278_s27   ;;  %s56_s13 = sadd.s32 1, %s1274_s26 }
  0x60   : > { %s53_s20 = ssub.s32 %s1278_s27, %s1465_s12  ;;  %p63_p9 = scmp.ne.s32.totalorder %s1274_s26, %s1270_s25 }
  0x61   : > { %p54_p13 = scmp.eq.s32.totalorder %s53_s20, 0  ;;  %p64_p12 = scmp.eq.s32.totalorder %s1278_s27, 0 }
  0x62   : > { %p1012_p0 = scmp.lt.s32.totalorder %s1278_s27, 2  ;;  %p1676_p2 = scmp.eq.s32.totalorder %s1354_s28, 1 }
  0x63   : > { %s1475_s15 = scalar_select %p54_p13, %s1274_s26, %s56_s13  }
  0x64   : > { %p65_p1 = por %p64_p12, %p63_p9  ;;  %p1479_p6 = por %p1676_p2, %p63_p9 }
  0x65   : > { %s270_s17 = sand.u32 1, %s1274_s26   ;;  %s886_s19 = sshll.u32 %s1278_s27, 7 }
  0x66   : > { %s1677_s16 = scalar_select %p1479_p6, 1, 0 }
  0x67   : > { %s1485_s14 = sshll.u32 %s270_s17, 3  ;;  %s1490_s21 = scalar_lea.hbm %s1652_s1, %s886_s19 }
  0x68   : > { %s274_s18 = scalar_lea.vmem [#allocation6], %s1485_s14  ;;  %p1493_p11 = pnand %p1012_p0, %p65_p1 }
  0x69   : > { %s281_s22 = sshll.u32 %s274_s18, 4  ;;  %s1502_s20 = scalar_lea.hbm %s1653_s2, %s886_s19  ;;  %s1497_s22 = int_to_ptr.vmem [resolvable:$true] %s281_s22 }
  0x6a   : > { %s271_s13 = scalar_lea.sflag [#allocation3], %s270_s17  ;;  %s1136_s29 = scalar_lea.hbm %s1490_s21, 128 }
  0x6b   : > { %p1137_p10 = scmp.ne.s32.totalorder %s1490_s21, %s1136_s29  ;;  %p1138_p3 = pneg %p1493_p11 }
  0x6c   : > { %s1141_s0 = scalar_lea.hbm %s1652_s1, 256  ;;  %p1142_p13 = scmp.lt.u32.totalorder %s1490_s21, %s1652_s1 }
  0x6d   : > { %p1139_p5 = pnand %p1138_p3, %p1137_p10  ;;  %p1143_p9 = scmp.lt.u32.totalorder %s1141_s0, %s1136_s29 }
  0x6e   : > { %p1145_p0 = scmp.lt.u32.totalorder %s1136_s29, %s1490_s21 }
  0x6f   : > { %p1140_p7 = pneg %p1139_p5  ;;  %p1144_p12 = por %p1143_p9, %p1142_p13 }
  0x71   : > { %p1146_p1 = por %p1145_p0, %p1144_p12 }
  0x73   : > { %p1147_p2 = pnand %p1146_p1, %p1140_p7 }
  0x75   : > { %1150 = shalt.err (!%p1147_p2)
}
  0x76   : > { %s1151_s17 = scalar_lea.vmem %s1497_s22, 128  ;;  %s1285_s19 = smov [#allocation6]  }
  0x77   : > { %p1152_p10 = scmp.ne.s32.totalorder %s1497_s22, %s1151_s17  ;;  %s1156_s23 = sshll.u32 %s1285_s19, 4  ;;  %s1157_s23 = int_to_ptr.vmem [resolvable:$false] %s1156_s23 }
  0x78   : > { %s1158_s3 = scalar_lea.vmem %s1157_s23, 256  ;;  %p1159_p4 = scmp.lt.s32.totalorder %s1497_s22, %s1157_s23 }
  0x79   : > { %p1154_p5 = pnand %p1152_p10, %p1138_p3  ;;  %p1160_p13 = scmp.lt.s32.totalorder %s1158_s3, %s1151_s17 }
  0x7b   : > { %p1155_p6 = pneg %p1154_p5  ;;  %p1161_p9 = por %p1160_p13, %p1159_p4 }
  0x7d   : > { %p1162_p12 = pnand %p1161_p9, %p1155_p6 }
  0x7f   : > { %1165 = shalt.err (!%p1162_p12)
}
  0x80   : > { %1001 = dma.hbm_to_vmem [thread:$0]  (!%p1493_p11), %s1490_s21, 128, %s1497_s22, %s271_s13  }
  0x81   : > { %s288_s0 = sand.u32 1, %s1278_s27   ;;  %s292_s4 = scalar_lea.vmem [#allocation7], %s1485_s14 }
  0x82   : > { %s299_s11 = sshll.u32 %s292_s4, 4  ;;  %s289_s29 = scalar_lea.sflag [#allocation8], %s288_s0  ;;  %s300_s11 = int_to_ptr.vmem [resolvable:$true] %s299_s11 }
  0x83   : > { %s1166_s10 = scalar_lea.hbm %s1502_s20, 128  ;;  %s1171_s19 = scalar_lea.hbm %s1653_s2, 256 }
  0x84   : > { %p1167_p4 = scmp.ne.s32.totalorder %s1502_s20, %s1166_s10  ;;  %p1172_p0 = scmp.lt.u32.totalorder %s1502_s20, %s1653_s2 }
  0x85   : > { %p1173_p1 = scmp.lt.u32.totalorder %s1171_s19, %s1166_s10  ;;  %p1175_p10 = scmp.lt.u32.totalorder %s1166_s10, %s1502_s20 }
  0x86   : > { %p1169_p6 = pnand %p1167_p4, %p1138_p3 }
  0x87   : > { %p1174_p2 = por %p1173_p1, %p1172_p0 }
  0x88   : > { %p1170_p7 = pneg %p1169_p6 }
  0x89   : > { %p1176_p5 = por %p1175_p10, %p1174_p2 }
  0x8b   : > { %p1177_p13 = pnand %p1176_p5, %p1170_p7 }
  0x8d   : > { %1180 = shalt.err (!%p1177_p13)
}
  0x8e   : > { %s1181_s14 = scalar_lea.vmem %s300_s11, 128  ;;  %s1286_s21 = smov [#allocation7]  }
  0x8f   : > { %p1182_p9 = scmp.ne.s32.totalorder %s300_s11, %s1181_s14  ;;  %s1186_s22 = sshll.u32 %s1286_s21, 4  ;;  %s1187_s22 = int_to_ptr.vmem [resolvable:$false] %s1186_s22 }
  0x90   : > { %s1188_s13 = scalar_lea.vmem %s1187_s22, 256  ;;  %p1189_p6 = scmp.lt.s32.totalorder %s300_s11, %s1187_s22 }
  0x91   : > { %p1184_p12 = pnand %p1182_p9, %p1138_p3  ;;  %p1190_p8 = scmp.lt.s32.totalorder %s1188_s13, %s1181_s14 }
  0x93   : > { %p1185_p4 = pneg %p1184_p12  ;;  %p1191_p0 = por %p1190_p8, %p1189_p6 }
  0x95   : > { %p1192_p1 = pnand %p1191_p0, %p1185_p4 }
  0x97   : > { %1195 = shalt.err (!%p1192_p1)
}
  0x98   : > { %1004 = dma.hbm_to_vmem [thread:$0]  (!%p1493_p11), %s1502_s20, 128, %s300_s11, %s289_s29  }
  0x99   : > { %p1679_p7 = scmp.ne.s32.totalorder %s1670_s9, 0 }
  0x9a   : > { %p1680_p2 = scmp.eq.s32.totalorder (!%p1679_p7), %s1354_s28, 0 }
  0x9b   : > { %308 = sbr.rel (%p1679_p7) target bundleno = 955 (0x3bb), region = 48 }
  0xa2   : > { %1241 = dma.done.wait (%p1680_p2), [#allocation5], 16   ;;  %p1681_p3 = pmov %p1680_p2 }
  0xa3   : > { %s1557_s0 = sand.u32 1, %s1270_s25   ;;  %p1682_p8 = scmp.ne.s32.totalorder %s1667_s30, 0 }
  0xa4   : > { %1243 = vsyncadd (%p1681_p3), [#allocation5], 4294967280  ;;  %s1560_s4 = sshll.u32 %s1557_s0, 3  ;;  %s315_s8 = scalar_lea.sflag [#allocation3], %s1557_s0 }
  0xa5   : > { %s318_s20 = scalar_lea.vmem [#allocation6], %s1560_s4 }
  0xa6   : > { %1245 = dma.done.wait (%p1682_p8), %s315_s8, 128  }
  0xa7   : > { %1247 = vsyncadd (%p1682_p8), %s315_s8, 4294967168  ;;  %s323_s9 = sand.u32 1, %s1354_s28   ;;  %s327_s29 = scalar_lea.vmem [#allocation7], %s1560_s4 }
  0xa8   : > { %s324_s11 = scalar_lea.sflag [#allocation8], %s323_s9 }
  0xa9   : > { %1249 = dma.done.wait (%p1682_p8), %s324_s11, 128  }
  0xaa   : > { %1251 = vsyncadd (%p1682_p8), %s324_s11, 4294967168  ;;  %p1683_p11 = pmov %p1680_p2 }
  0xab   : > { %p1684_p10 = pmov %p1680_p2 }
  0xac   : > { %1253 = dma.done.wait (%p1683_p11), [#allocation8], 512  }
  0xad   : > { %1255 = vsyncadd (%p1684_p10), [#allocation8], 4294966784  ;;  %p1685_p5 = pmov %p1680_p2 }
  0xae   : > { %p1686_p13 = pmov %p1680_p2 }
  0xaf   : > { %1257 = dma.done.wait (%p1685_p5), [#allocation11], 512  }
  0xb0   : > { %1259 = vsyncadd (%p1686_p13), [#allocation11], 4294966784 }
  0xb1   : > { %340 = sfence }
  0xb2   : > { %v381_v0 = vld [vmem:[#allocation9] sm:$0xff]  ;;  %v382_v1 = vld [vmem:[#allocation9 + $0x8] sm:$0xff]  ;;  %v383_v2 = vld [vmem:[#allocation9 + $0x10] sm:$0xff]  ;;  %v1287_v3 = vmov 0.0|0.0   ;;  %vm1288_vm0 = vmmov 0   ;;  %v1289_v11 = vmov 0.0  }
  0xb3   : > { %958 = vmatprep.subr.bf16.mxu0 %v1287_v3  ;;  %v959_v4 = vpack.c.bf16 %v382_v1, %v381_v0  ;;  %v384_v5 = vld [vmem:[#allocation9 + $0x18] sm:$0xff]  ;;  %964 = vmatprep.subr.bf16.mxu1 %v1287_v3  ;;  %v459_v6 = vld [vmem:[#allocation10] sm:$0xff]  ;;  %v460_v7 = vld [vmem:[#allocation10 + $0x8] sm:$0xff]  ;;  %s1290_s18 = smov 32   ;;  %vm385_vm1 = vcmask 261120   ;;  %s374_s17 = sld [smem:[#allocation2]] }
  0xb4   : > { %v965_v8 = vpack.c.bf16 %v460_v7, %v459_v6  ;;  %v461_v9 = vld [vmem:[#allocation10 + $0x10] sm:$0xff]  ;;  %v462_v10 = vld [vmem:[#allocation10 + $0x18] sm:$0xff]  ;;  %934 = vmatprep.mubr.msk.f32.mxu0 %vm1288_vm0, %v1289_v11  ;;  %945 = vmatprep.mubr.msk.f32.mxu1 %vm1288_vm0, %v1289_v11  ;;  %v962_v12 = vpack.c.bf16 %v384_v5, %v383_v2  ;;  %v372_v13 = vld [vmem:[%s318_s20] sm:$0xff]  ;;  %s896_s19 = sld [smem:[#allocation2 + $0x1]]  ;;  %s897_s23 = sld [smem:[#allocation2 + $0x2]]  ;;  %vm637_vm2 = vcmask 64512  }
  0xb5   : > { %960 = vmatpush3.bf16.msra.mxu0 %v959_v4  ;;  %v373_v14 = vld [vmem:[%s327_s29] sm:$0xff]  ;;  %v903_v15 = vld [vmem:[%s1657_s6] ss:$0 sm:$0xff]  ;;  %v968_v16 = vpack.c.bf16 %v462_v10, %v461_v9  ;;  %s898_s21 = sld [smem:[#allocation2 + $0x3]]  ;;  %s1291_s22 = smov 96  }
  0xb6   : > { %961 = vmatprep.subr.bf16.mxu0 %v1287_v3  ;;  %966 = vmatpush3.bf16.msra.mxu1 %v965_v8  ;;  %v379_v17 = vadd.f32 %v373_v14, %v372_v13  ;;  %v380_v18 = vmul.f32 %v373_v14, %v372_v13  ;;  %v902_v27 = vld [vmem:[%s1656_s5] ss:$0 sm:$0xff]  ;;  %s899_s13 = sld [smem:[#allocation2 + $0x4]]  ;;  %s909_s8 = sshll.u32 %s1354_s28, 7 }
  0xb7   : > { %967 = vmatprep.subr.bf16.mxu1 %v1287_v3  ;;  %552 = vrot.lane.b32.xlu1 %v903_v15, %s1290_s18  ;;  %s371_s20 = scalar_lea.vmem [#allocation12], %s1560_s4  ;;  %s1606_s30 = scalar_lea.hbm %s1658_s7, %s909_s8 }
  0xb8   : > { %s755_s9 = sshll.u32 %s371_s20, 4  ;;  %s742_s10 = scalar_lea.sflag [#allocation4], %s1557_s0  ;;  %s1608_s9 = int_to_ptr.vmem [resolvable:$true] %s755_s9 }
  0xb9   : > { %963 = vmatpush3.bf16.msra.mxu0 %v962_v12  ;;  %v722_v19 = vstv %s374_s17  ;;  %s1196_s28 = scalar_lea.vmem %s1608_s9, 128  ;;  %p1687_p12 = scmp.ne.s32.totalorder %s1677_s16, 0 }
  0xba   : > { %969 = vmatpush3.bf16.msra.mxu1 %v968_v16  ;;  %948 = vmatprep.subr.mxu0 %v1289_v11  ;;  %v724_v20 = vstv %s896_s19  ;;  %v723_v21 = vmul.f32 %v722_v19, %v379_v17  ;;  %v727_v31 = vstv %s897_s23  ;;  %p1197_p9 = scmp.ne.s32.totalorder %s1608_s9, %s1196_s28  ;;  %s1292_s4 = smov [#allocation12]  }
  0xbb   : > { %562 = vrot.lane.b32.xlu1 %v373_v14, %s1290_s18  ;;  %953 = vmatprep.subr.mxu1 %v1289_v11  ;;  %v725_v22 = vmul.f32 %v724_v20, %v380_v18  ;;  %v730_v52 = vstv %s898_s21  ;;  %s1200_s18 = sshll.u32 %s1292_s4, 4  ;;  %s1201_s18 = int_to_ptr.vmem [resolvable:$false] %s1200_s18 }
  0xbc   : > { %935 = vmatmul.mubr.msk.f32.vlgmr.msra.gmra.mrb[0].mxu0 %vm385_vm1, %v372_v13  ;;  %v737_v58 = vstv %s899_s13  ;;  %p1198_p4 = pnand %p1197_p9, %p1687_p12  ;;  %s1202_s17 = scalar_lea.vmem %s1201_s18, 256 }
  0xbd   : > { %946 = vmatmul.mubr.msk.f32.vlgmr.msra.gmra.mrb[0].mxu1 %vm385_vm1, %v373_v14  ;;  %950 = vmatprep.mubr.msk.f32.mxu0 %vm1288_vm0, %v1289_v11  ;;  %v726_v23 = vadd.f32 %v725_v22, %v723_v21  ;;  %p1203_p0 = scmp.lt.s32.totalorder %s1608_s9, %s1201_s18  ;;  %p1204_p1 = scmp.lt.s32.totalorder %s1202_s17, %s1196_s28 }
  0xbe   : > { %954 = vmatpush3.msra.mxu1 %v373_v14  ;;  %955 = vmatprep.mubr.msk.f32.mxu1 %vm1288_vm0, %v1289_v11  ;;  %p1199_p6 = pneg %p1198_p4 }
  0xbf   : > { %p1205_p7 = por %p1204_p1, %p1203_p0 }
  0xc1   : > { %p1206_p2 = pnand %p1205_p7, %p1199_p6 }
  0xc2   : > { %949 = vmatpush3.xpose.msk.msra.mxu0 %vm385_vm1, %v373_v14 }
  0xc5   : > { %951 = vmatmul.mubr.msk.f32.vlgmr.msra.gmra.mrb[2].mxu0 %vm385_vm1, %v372_v13 }
 0x129   : > { %v553_v39 = vpop.permute.xlu1 %552 }
 0x12d   : > { %v563_v50 = vpop.permute.xlu1 %562 }
 0x18f   : > { %v455_v24 = vpop.f32.mrb[0].mxu0 }
 0x190   : > { %v936_v25 = vpop.f32.mrb[1].mxu0  ;;  %v532_v26 = vpop.f32.mrb[0].mxu1  ;;  %v555_v40 = vadd.f32 %v553_v39, %v455_v24 }
 0x191   : > { %v536_v28 = vadd.f32 %v532_v26, %v455_v24  ;;  %v947_v29 = vpop.f32.mrb[1].mxu1 }
 0x192   : > { %v904_v41 = vmul.f32 -1.442695, %v555_v40 }
 0x193   : > { %v544_v30 = vadd.f32 %v902_v27, %v536_v28 }
 0x194   : > { %1059 = vpow2.f32 %v904_v41 }
 0x195   : > { %v545_v32 = vmax.f32 %v544_v30, 0.0 }
 0x197   : > { %v728_v33 = vmul.f32 %v727_v31, %v545_v32 }
 0x198   : > { %v632_v34 = vpop.f32.mrb[2].mxu0 }
 0x199   : > { %v636_v35 = vmul.f32 0.17677669, %v632_v34  ;;  %v952_v36 = vpop.f32.mrb[3].mxu0  ;;  %v729_v37 = vadd.f32 %v728_v33, %v726_v23 }
 0x19b   : > { %v638_v38 = vsel %vm637_vm2, %v636_v35, -inf }
 0x19c   : > { %639 = vmax.xlane.f32.xlu0 %v638_v38 }
 0x19e   : > { %v1060_v45 = vpop.eup %1059 }
 0x19f   : > { %v559_v47 = vadd.f32 1.0, %v1060_v45 }
 0x229   : > { %v640_v42 = vpop.xlane.xlu0 %639 }
 0x22a   : > { %v641_v43 = vsub.f32 %v636_v35, %v640_v42 }
 0x22c   : > { %v642_v44 = vmul.f32 1.442695, %v641_v43 }
 0x22e   : > { %1061 = vpow2.f32 %v642_v44 }
 0x22f   : > { %1063 = vrcp.f32 %v559_v47 }
 0x238   : > { %v1062_v46 = vpop.eup %1061 }
 0x239   : > { %v644_v48 = vsel %vm637_vm2, %v1062_v46, 0.0  ;;  %v1064_v49 = vpop.eup %1063 }
 0x23a   : > { %645 = vadd.xlane.f32.xlu0 %v644_v48  ;;  %v565_v51 = vmul.f32 %v1064_v49, %v563_v50 }
 0x23c   : > { %v731_v53 = vmul.f32 %v730_v52, %v565_v51 }
 0x250   : > { %733 = vrot.lane.b32.xlu0 %v731_v53, %s1291_s22 }
 0x2c7   : > { %v646_v54 = vpop.xlane.xlu0 %645 }
 0x2c8   : > { %1065 = vrcp.f32 %v646_v54 }
 0x2cb   : > { %v734_v57 = vpop.permute.xlu0 %733 }
 0x2cc   : > { %v736_v60 = vadd.f32 %v734_v57, %v729_v37 }
 0x2d2   : > { %v1066_v55 = vpop.eup %1065 }
 0x2d3   : > { %v648_v56 = vmul.f32 %v1066_v55, %v1062_v46 }
 0x2d5   : > { %956 = vmatmul.mubr.msk.f32.vlgmr.msra.gmra.mrb[2].mxu1 %vm637_vm2, %v648_v56 }
 0x3a8   : > { %v718_v59 = vpop.f32.mrb[2].mxu1 }
 0x3a9   : > { %v738_v61 = vmul.f32 %v737_v58, %v718_v59  ;;  %v957_v62 = vpop.f32.mrb[3].mxu1 }
 0x3ab   : > { %v739_v63 = vadd.f32 %v738_v61, %v736_v60 }
 0x3ad   : > { %740 = vst.msk [vmem:[%s371_s20] sm:$0xff] %vm385_vm1, %v739_v63 }
 0x3ae   : > { %1209 = shalt.err (!%p1206_p2)
}
 0x3af   : > { %s1210_s0 = scalar_lea.hbm %s1606_s30, 128  ;;  %s1214_s3 = scalar_lea.hbm %s1658_s7, 256 }
 0x3b0   : > { %p1211_p3 = scmp.ne.s32.totalorder %s1606_s30, %s1210_s0  ;;  %p1215_p10 = scmp.lt.u32.totalorder %s1606_s30, %s1658_s7 }
 0x3b1   : > { %p1216_p5 = scmp.lt.u32.totalorder %s1214_s3, %s1210_s0  ;;  %p1218_p9 = scmp.lt.u32.totalorder %s1210_s0, %s1606_s30 }
 0x3b2   : > { %p1212_p8 = pnand %p1211_p3, %p1687_p12 }
 0x3b3   : > { %p1217_p13 = por %p1216_p5, %p1215_p10 }
 0x3b4   : > { %p1213_p11 = pneg %p1212_p8 }
 0x3b5   : > { %p1219_p4 = por %p1218_p9, %p1217_p13 }
 0x3b7   : > { %p1220_p6 = pnand %p1219_p4, %p1213_p11 }
 0x3b9   : > { %1223 = shalt.err (!%p1220_p6)
}
 0x3ba   : > { %986 = dma.vmem_to_hbm [thread:$0]  (%p1687_p12), %s1608_s9, 128, %s1606_s30, %s742_s10  }
 0x3bb PF: > { %s1688_s22 = sld [smem:[#allocation19_spill]]  ;;  %s767_s13 = sand.u32 1, %s1266_s24  }
 0x3bc   : > { %p1690_p1 = scmp.ge.s32.totalorder %s1278_s27, 2  ;;  %s768_s8 = scalar_lea.sflag [#allocation4], %s767_s13 }
 0x3c1   : > { %p1689_p0 = scmp.ne.s32.totalorder %s1688_s22, 0 }
 0x3c3   : > { %p1006_p7 = pnand %p1690_p1, %p1689_p0 }
 0x3c5   : > { %1261 = dma.done.wait (!%p1006_p7), %s768_s8, 128  }
 0x3c6   : > { %1263 = vsyncadd (!%p1006_p7), %s768_s8, 4294967168  ;;  %p25_p2 = scmp.ge.s32.totalorder %s1465_s12, 4   ;;  %s1691_s24 = smov %s1270_s25 }
 0x3c7   : > { %s1692_s25 = smov %s1274_s26  ;;  %s1693_s26 = smov %s1475_s15 }
 0x3c8   : > { %s1694_s27 = smov %s1465_s12  ;;  %27 = sbr.rel (!%p25_p2) target bundleno = 13 (0xd), region = 119 }
 0x3cf   :  { %773 = vsyncpa [#allocation3], 1 }
 0x3d0   :  { %775 = vsyncpa [#allocation3 + $0x1], 1 }
 0x3d1   :  { %776 = vsyncpa [#allocation8], 1 }
 0x3d2   :  { %778 = vsyncpa [#allocation8 + $0x1], 1 }
 0x3d3   :  { %779 = vsyncpa [#allocation11], 1 }
 0x3d4   :  { %780 = vsyncpa [#allocation4], 1 }
 0x3d5   :  { %782 = vsyncpa [#allocation4 + $0x1], 1 }
 0x3d6   :  { %783 = vsyncpa [#allocation5], 1 }
 0x3d7   :  { %785 = vsyncpa [#allocation5 + $0x1], 1 }

</bundles_post_ra>
